<compile_context>
chip_gen: v5e
topology: v5e:2x2
jax: 0.10.0
libtpu: 0.0.40
codegen_flags: <defaults>
</compile_context>

<pallas_src>
import math

import jax
import jax.numpy as jnp
from jax import lax
from jax.experimental import pallas as pl
from jax.experimental.pallas import tpu as pltpu


def _clamp_vmem(nbytes):
    """Scoped-VMEM request: generous headroom, >= 32 MiB, <= 64 MiB (valid on all gens)."""
    return int(min(64 << 20, max(32 << 20, int(nbytes))))


def _pick_row_tile(H, W, two_f, out_itemsize, target_bytes=4 * 1024 * 1024):
    """Rows per output tile TH and padded height H_pad (a multiple of TH).

    TH is either H itself (single tile) or a multiple of 8, so the (1, TH, W)
    y/x input blocks stay sublane-aligned and output stores are full width."""
    bytes_per_row = W * two_f * out_itemsize
    max_rows = max(1, int(target_bytes // bytes_per_row))
    if H <= max_rows:
        return H, H
    best = 0
    for th in range(8, max_rows + 1, 8):
        if H % th == 0:
            best = th
    if best:
        return best, H
    # No 8-aligned divisor fits: fixed 8-aligned tile, pad H up and crop afterwards.
    th = max(8, (max_rows // 8) * 8)
    h_pad = ((H + th - 1) // th) * th
    return th, h_pad


def position_embedding_sine_2d(
    mask,                       # (B, H, W) bool -- True = padded pixel
    num_pos_feats=64,
    temperature=10000,
    normalize=False,
    scale=None,
    channels_last=False,        # True -> return NHWC (skip the NCHW permute; ~3x less HBM)
    out_dtype=jnp.float32,      # jnp.bfloat16 halves the dominant HBM write
):
    if not isinstance(temperature, (list, tuple)):
        temperature = (temperature, temperature)
    if scale is not None and normalize is False:
        raise ValueError("normalize should be True if scale is passed")
    if scale is None:
        scale = 2 * math.pi
    if num_pos_feats % 2 != 0:
        raise ValueError("num_pos_feats must be even (sin/cos interleave)")

    mask = mask.astype(jnp.bool_)
    B, H, W = mask.shape
    F = num_pos_feats
    F2 = 2 * F

    # ---- constant setup (glue, plain JAX; tiny shapes) ----
    i = jnp.arange(F, dtype=jnp.float32)
    expo = 2.0 * jnp.floor(i / 2.0) / F
    dim_tx = (temperature[0] ** expo).astype(jnp.float32)        # x freqs (last F channels)
    dim_ty = (temperature[1] ** expo).astype(jnp.float32)        # y freqs (first F channels)
    inv_freq = jnp.concatenate([1.0 / dim_ty, 1.0 / dim_tx])     # (2F,) reciprocal multiply
    phase = jnp.tile(jnp.array([0.0, math.pi / 2.0], jnp.float32), F)  # (2F,) sin/cos select
    consts = jnp.stack([inv_freq, phase], axis=0)                # (2, 2F) single lane-wide const

    # cumsum-as-matmul operands: exact 0/1 values, so bf16 operands + f32 accumulation
    # are bit-identical to the f32 matmul while halving DMA/VMEM (one MXU bf16 pass).
    rh = jnp.arange(H)
    tril_h = (rh[:, None] >= rh[None, :]).astype(jnp.bfloat16)   # (H, H) lower-tri ones
    rw = jnp.arange(W)
    triu_w = (rw[:, None] <= rw[None, :]).astype(jnp.bfloat16)   # (W, W) upper-tri ones

    # ---- kernel 1: per-image cumsums (+ normalization) on the MXU, grid=(B,) ----
    def cumsum_kernel(mask_ref, tril_ref, triu_ref, y_ref, x_ref):
        nm = jnp.where(mask_ref[0], 0.0, 1.0).astype(jnp.bfloat16)            # (H, W)
        y_embed = jnp.dot(tril_ref[...], nm, preferred_element_type=jnp.float32)
        x_embed = jnp.dot(nm, triu_ref[...], preferred_element_type=jnp.float32)
        if normalize:
            eps = 1e-6
            y_embed = y_embed * (scale / (y_embed[-1:, :] + eps))             # (H,W)*(1,W)
            x_embed = x_embed * (scale / (x_embed[:, -1:] + eps))             # (H,W)*(H,1)
        y_ref[0] = y_embed
        x_ref[0] = x_embed

    prologue_bytes = 2 * (H * W * 1 + H * H * 2 + W * W * 2 + 2 * H * W * 4) + (4 << 20)
    y_embed, x_embed = pl.pallas_call(
        cumsum_kernel,
        out_shape=(jax.ShapeDtypeStruct((B, H, W), jnp.float32),
                   jax.ShapeDtypeStruct((B, H, W), jnp.float32)),
        grid_spec=pltpu.PrefetchScalarGridSpec(
            num_scalar_prefetch=0,
            grid=(B,),
            in_specs=[
                pl.BlockSpec((1, H, W), lambda b: (b, 0, 0)),    # bool mask (1 B/elem DMA)
                pl.BlockSpec((H, H), lambda b: (0, 0)),          # lower-tri ones (bf16)
                pl.BlockSpec((W, W), lambda b: (0, 0)),          # upper-tri ones (bf16)
            ],
            out_specs=(pl.BlockSpec((1, H, W), lambda b: (b, 0, 0)),
                       pl.BlockSpec((1, H, W), lambda b: (b, 0, 0))),
        ),
        compiler_params=pltpu.CompilerParams(
            dimension_semantics=("parallel",),
            vmem_limit_bytes=_clamp_vmem(prologue_bytes),
        ),
    )(mask, tril_h, triu_w)

    # ---- row tiling (8-aligned, pad + crop if H has no suitable divisor) ----
    out_itemsize = jnp.dtype(out_dtype).itemsize
    TH, H_pad = _pick_row_tile(H, W, F2, out_itemsize)
    R = H_pad // TH
    if H_pad != H:
        pad = ((0, 0), (0, H_pad - H), (0, 0))
        y_embed = jnp.pad(y_embed, pad)
        x_embed = jnp.pad(x_embed, pad)

    # ---- kernel 2: lane-dense expansion, one fused sin per output element ----
    def expand_kernel(y_ref, x_ref, const_ref, out_ref):
        y = y_ref[0]                                             # (TH, W)
        x = x_ref[0]                                             # (TH, W)
        cv = const_ref[...]                                      # (2, 2F)
        inv_f = cv[0:1].reshape(1, 1, F2)
        ph = cv[1:2].reshape(1, 1, F2)
        lane = lax.broadcasted_iota(jnp.int32, (1, 1, F2), 2)
        embed = jnp.where(lane < F, y[:, :, None], x[:, :, None])   # (TH, W, 2F)
        # cos(t) is computed as sin(t + pi/2): one transcendental per output element.
        # TODO(synk): on v6e/v7x a bounded-range bf16 sin polynomial (normalize=True only)
        # would cut the VPU cost further; keeping the generic lowering for exactness.
        out_ref[0] = jnp.sin(embed * inv_f + ph).astype(out_ref.dtype)

    expand_bytes = 2 * (TH * W * F2 * out_itemsize + 2 * TH * W * 4 + 2 * F2 * 4) + (4 << 20)
    pos_nhwc = pl.pallas_call(
        expand_kernel,
        out_shape=jax.ShapeDtypeStruct((B, H_pad, W, F2), out_dtype),
        grid_spec=pltpu.PrefetchScalarGridSpec(
            num_scalar_prefetch=0,
            grid=(B, R),
            in_specs=[
                pl.BlockSpec((1, TH, W), lambda b, r: (b, r, 0)),   # y_embed tile
                pl.BlockSpec((1, TH, W), lambda b, r: (b, r, 0)),   # x_embed tile
                pl.BlockSpec((2, F2), lambda b, r: (0, 0)),         # inv_freq + phase (~1 KB)
            ],
            out_specs=pl.BlockSpec((1, TH, W, F2), lambda b, r: (b, r, 0, 0)),
        ),
        compiler_params=pltpu.CompilerParams(
            # No scratch carry -> both axes independent; lets v7x's two TensorCores
            # split the row-tile axis even when B == 1.
            dimension_semantics=("parallel", "parallel"),
            vmem_limit_bytes=_clamp_vmem(expand_bytes),
        ),
    )(y_embed, x_embed, consts)

    if H_pad != H:
        pos_nhwc = pos_nhwc[:, :H]

    if channels_last:
        return pos_nhwc  # (B, H, W, 2F) -- preferred when the consumer accepts NHWC
    # NHWC -> NCHW to match the PyTorch module's .permute(0, 3, 1, 2).
    return jnp.transpose(pos_nhwc, (0, 3, 1, 2))  # (B, 2F, H, W)


def _reference(mask, num_pos_feats=64, temperature=(10000, 10000),
               normalize=False, scale=2 * math.pi):
    """Pure-jnp reference mirroring the PyTorch forward (NCHW output)."""
    not_mask = (~mask).astype(jnp.float32)
    y_embed = jnp.cumsum(not_mask, axis=1)
    x_embed = jnp.cumsum(not_mask, axis=2)
    if normalize:
        eps = 1e-6
        y_embed = y_embed / (y_embed[:, -1:, :] + eps) * scale
        x_embed = x_embed / (x_embed[:, :, -1:] + eps) * scale
    F = num_pos_feats
    i = jnp.arange(F, dtype=jnp.float32)
    dim_tx = temperature[0] ** (2 * jnp.floor(i / 2) / F)
    dim_ty = temperature[1] ** (2 * jnp.floor(i / 2) / F)
    pos_x = x_embed[:, :, :, None] / dim_tx
    pos_y = y_embed[:, :, :, None] / dim_ty
    pos_x = jnp.stack(
        (jnp.sin(pos_x[:, :, :, 0::2]), jnp.cos(pos_x[:, :, :, 1::2])), axis=4
    ).reshape(*pos_x.shape[:3], -1)
    pos_y = jnp.stack(
        (jnp.sin(pos_y[:, :, :, 0::2]), jnp.cos(pos_y[:, :, :, 1::2])), axis=4
    ).reshape(*pos_y.shape[:3], -1)
    pos = jnp.concatenate((pos_y, pos_x), axis=3)
    return jnp.transpose(pos, (0, 3, 1, 2))


if __name__ == "__main__":
    key = jax.random.PRNGKey(0)
    B, C, H, W = 2, 4, 16, 16
    num_pos_feats = 64

    # x only matters for device placement in the original module; unused in compute.
    x = jax.random.normal(key, (B, C, H, W), dtype=jnp.float32)

    # deterministic padding mask: True where the pixel is padding
    valid_h = jnp.array([12, 16])
    valid_w = jnp.array([16, 10])
    hh = jnp.arange(H)[None, :, None]
    ww = jnp.arange(W)[None, None, :]
    mask = (hh >= valid_h[:, None, None]) | (ww >= valid_w[:, None, None])  # (B,H,W) bool

    # module defaults (normalize=False): NCHW float32
    pos = jax.block_until_ready(position_embedding_sine_2d(mask, num_pos_feats=num_pos_feats))
    ref = _reference(mask, num_pos_feats=num_pos_feats)
    assert pos.shape == (B, 2 * num_pos_feats, H, W), pos.shape
    assert jnp.allclose(pos, ref, atol=1e-4, rtol=1e-4), "mismatch vs reference"

    # normalized variant (exercises the normalize branch of the cumsum kernel)
    pos_n = jax.block_until_ready(
        position_embedding_sine_2d(mask, num_pos_feats=num_pos_feats, normalize=True))
    ref_n = _reference(mask, num_pos_feats=num_pos_feats, normalize=True)
    assert jnp.allclose(pos_n, ref_n, atol=1e-4, rtol=1e-4), "mismatch vs reference (normalize)"

    # perf-path variant: NHWC + bf16 output (skips the permute, halves the HBM write)
    pos_fast = jax.block_until_ready(
        position_embedding_sine_2d(mask, num_pos_feats=num_pos_feats,
                                   channels_last=True, out_dtype=jnp.bfloat16))
    assert pos_fast.shape == (B, H, W, 2 * num_pos_feats), pos_fast.shape
    ref_nhwc = jnp.transpose(ref, (0, 2, 3, 1))
    assert jnp.allclose(pos_fast.astype(jnp.float32), ref_nhwc, atol=2e-2), "mismatch (bf16 NHWC)"

    print("KERNEL_OK")
</pallas_src>

<mosaic_0001>
module attributes {stable_mosaic.version = 11 : i64} {
  func.func @cumsum_kernel(%arg0: i32, %arg1: memref<1x16x16xi32, #tpu.memory_space<vmem>>, %arg2: memref<16x16xbf16, #tpu.memory_space<vmem>>, %arg3: memref<16x16xbf16, #tpu.memory_space<vmem>>, %arg4: memref<1x16x16xf32, #tpu.memory_space<vmem>>, %arg5: memref<1x16x16xf32, #tpu.memory_space<vmem>>) attributes {dimension_semantics = [#tpu.dimension_semantics<parallel>], iteration_bounds = array<i64: 2>, scalar_prefetch = 0 : i64, scratch_operands = 0 : i64, tpu.core_type = #tpu.core_type<tc>, window_params = [{transform_indices = @transform_0, window_bounds = array<i64: 1, 16, 16>}, {pipeline_mode = #tpu.pipeline_mode<synchronous>, transform_indices = @transform_1, window_bounds = array<i64: 16, 16>}, {pipeline_mode = #tpu.pipeline_mode<synchronous>, transform_indices = @transform_2, window_bounds = array<i64: 16, 16>}, {transform_indices = @transform_3, window_bounds = array<i64: 1, 16, 16>}, {transform_indices = @transform_4, window_bounds = array<i64: 1, 16, 16>}]} {
    %c0 = arith.constant 0 : index
    %c0_0 = arith.constant 0 : index
    %c0_1 = arith.constant 0 : index
    %0 = vector.load %arg1[%c0, %c0_0, %c0_1] : memref<1x16x16xi32, #tpu.memory_space<vmem>>, vector<1x16x16xi32>
    %1 = vector.shape_cast %0 : vector<1x16x16xi32> to vector<16x16xi32>
    %cst = arith.constant dense<0> : vector<16x16xi32>
    %2 = arith.cmpi ne, %1, %cst : vector<16x16xi32>
    %cst_2 = arith.constant 0.000000e+00 : f32
    %cst_3 = arith.constant 1.000000e+00 : f32
    %3 = vector.broadcast %cst_2 : f32 to vector<16x16xf32>
    %4 = vector.broadcast %cst_3 : f32 to vector<16x16xf32>
    %5 = arith.select %2, %3, %4 : vector<16x16xi1>, vector<16x16xf32>
    %6 = arith.truncf %5 : vector<16x16xf32> to vector<16x16xbf16>
    %c0_4 = arith.constant 0 : index
    %c0_5 = arith.constant 0 : index
    %7 = vector.load %arg2[%c0_4, %c0_5] : memref<16x16xbf16, #tpu.memory_space<vmem>>, vector<16x16xbf16>
    %cst_6 = arith.constant dense<0.000000e+00> : vector<16x16xf32>
    %8 = tpu.matmul %7, %6, %cst_6 {dimension_numbers = #tpu.dot_dimension_numbers<[1], [0], [0], [1], [0, 0, 1, 1], [], []>} : vector<16x16xbf16>, vector<16x16xbf16>, vector<16x16xf32> -> vector<16x16xf32>
    %c0_7 = arith.constant 0 : index
    %c0_8 = arith.constant 0 : index
    %9 = vector.load %arg3[%c0_7, %c0_8] : memref<16x16xbf16, #tpu.memory_space<vmem>>, vector<16x16xbf16>
    %cst_9 = arith.constant dense<0.000000e+00> : vector<16x16xf32>
    %10 = tpu.matmul %6, %9, %cst_9 {dimension_numbers = #tpu.dot_dimension_numbers<[1], [0], [0], [1], [0, 0, 1, 1], [], []>} : vector<16x16xbf16>, vector<16x16xbf16>, vector<16x16xf32> -> vector<16x16xf32>
    %c0_10 = arith.constant 0 : index
    %c0_11 = arith.constant 0 : index
    %c0_12 = arith.constant 0 : index
    %11 = vector.load %arg4[%c0_10, %c0_11, %c0_12] : memref<1x16x16xf32, #tpu.memory_space<vmem>>, vector<1x16x16xf32>
    %12 = vector.shape_cast %11 : vector<1x16x16xf32> to vector<16x16xf32>
    %13 = vector.shape_cast %8 : vector<16x16xf32> to vector<1x16x16xf32>
    tpu.vector_store %arg4[%c0_10, %c0_11, %c0_12], %13 {strides = array<i32>} : memref<1x16x16xf32, #tpu.memory_space<vmem>>, vector<1x16x16xf32>,
    %c0_13 = arith.constant 0 : index
    %c0_14 = arith.constant 0 : index
    %c0_15 = arith.constant 0 : index
    %14 = vector.load %arg5[%c0_13, %c0_14, %c0_15] : memref<1x16x16xf32, #tpu.memory_space<vmem>>, vector<1x16x16xf32>
    %15 = vector.shape_cast %14 : vector<1x16x16xf32> to vector<16x16xf32>
    %16 = vector.shape_cast %10 : vector<16x16xf32> to vector<1x16x16xf32>
    tpu.vector_store %arg5[%c0_13, %c0_14, %c0_15], %16 {strides = array<i32>} : memref<1x16x16xf32, #tpu.memory_space<vmem>>, vector<1x16x16xf32>,
    return
  }
  func.func @transform_0(%arg0: i32) -> (i32, i32, i32) {
    %c0_i32 = arith.constant 0 : i32
    %c0_i32_0 = arith.constant 0 : i32
    %c0_i32_1 = arith.constant 0 : i32
    return %arg0, %c0_i32, %c0_i32_0 : i32, i32, i32
  }
  func.func @transform_1(%arg0: i32) -> (i32, i32) {
    %c0_i32 = arith.constant 0 : i32
    %c0_i32_0 = arith.constant 0 : i32
    %c0_i32_1 = arith.constant 0 : i32
    return %c0_i32, %c0_i32_0 : i32, i32
  }
  func.func @transform_2(%arg0: i32) -> (i32, i32) {
    %c0_i32 = arith.constant 0 : i32
    %c0_i32_0 = arith.constant 0 : i32
    %c0_i32_1 = arith.constant 0 : i32
    return %c0_i32, %c0_i32_0 : i32, i32
  }
  func.func @transform_3(%arg0: i32) -> (i32, i32, i32) {
    %c0_i32 = arith.constant 0 : i32
    %c0_i32_0 = arith.constant 0 : i32
    %c0_i32_1 = arith.constant 0 : i32
    return %arg0, %c0_i32, %c0_i32_0 : i32, i32, i32
  }
  func.func @transform_4(%arg0: i32) -> (i32, i32, i32) {
    %c0_i32 = arith.constant 0 : i32
    %c0_i32_0 = arith.constant 0 : i32
    %c0_i32_1 = arith.constant 0 : i32
    return %arg0, %c0_i32, %c0_i32_0 : i32, i32, i32
  }
}

</mosaic_0001>

<bundles_post_ra>
// kernel: tpu_custom_call.1
= control target key start
LH: loop header
LB: loop body
LE: loop exit
PB: predicated region body
PF: predicated region fallthrough
CT: control target
= control target key end

     0   :  { %10 = vsyncpa [#allocation3], 0  ;;  %s737_s0 = inlined_call_operand.vmem [shape: s32[2,16,16], index: 0, kind: input, shape index: {}]   ;;  %s738_s1 = inlined_call_operand.vmem [shape: bf16[16,16], index: 1, kind: input, shape index: {}]   ;;  %s739_s2 = inlined_call_operand.vmem [shape: bf16[16,16], index: 2, kind: input, shape index: {}]   ;;  %s740_s3 = inlined_call_operand.hbm [shape: f32[2,16,16], index: 3, kind: output, shape index: {0}]   ;;  %s741_s4 = inlined_call_operand.hbm [shape: f32[2,16,16], index: 4, kind: output, shape index: {1}]  }
   0x1   :  { %12 = vsyncpa [#allocation3 + $0x1], 0 }
   0x2   :  { %13 = vsyncpa [#allocation5], 0 }
   0x3   :  { %15 = vsyncpa [#allocation5 + $0x1], 0  ;;  %s610_s15 = smov 0   ;;  %s612_s16 = smov 0  }
   0x4   :  { %s614_s17 = smov 0   ;;  %s616_s18 = smov 0  }
   0x5 LB: > { %s631_s19 = sadd.s32 4294967295, %s579_s18   ;;  %s402_s20 = sadd.s32 4294967294, %s579_s18   ;;  %s579_s18 = sphi %s616_s18, %s747_s18   ;;  %s575_s17 = sphi %s614_s17, %s746_s17   ;;  %s571_s16 = sphi %s612_s16, %s745_s16   ;;  %s567_s15 = sphi %s610_s15, %s744_s15  }
   0x6   : > { %s635_s21 = sadd.s32 1, %s579_s18   ;;  %s96_s22 = sadd.s32 1, %s575_s17 }
   0x7   : > { %s93_s23 = ssub.s32 %s579_s18, %s635_s21  ;;  %p106_p0 = scmp.ne.s32.totalorder %s575_s17, %s571_s16 }
   0x8   : > { %p94_p1 = scmp.eq.s32.totalorder %s93_s23, 0  ;;  %p107_p2 = scmp.eq.s32.totalorder %s631_s19, 1 }
   0x9   : > { %p112_p3 = scmp.ne.s32.totalorder %s571_s16, %s567_s15  ;;  %p113_p4 = scmp.eq.s32.totalorder %s402_s20, 1 }
   0xa   : > { %s646_s24 = scalar_select %p94_p1, %s575_s17, %s96_s22  }
   0xb   : > { %p648_p5 = por %p107_p2, %p106_p0  ;;  %p652_p6 = por %p113_p4, %p112_p3 }
   0xc   : > { %p405_p7 = scmp.ge.s32.totalorder %s579_s18, 1  ;;  %p171_p8 = scmp.lt.s32.totalorder %s579_s18, 3 }
   0xe   : > { %p172_p9 = pnand %p405_p7, %p171_p8 }
   0xf   : > { %p202_p10 = scmp.lt.s32.totalorder (!%p172_p9), %s631_s19, 1  ;;  %s672_s10 = sand.u32 (!%p172_p9), 1, %s571_s16  }
  0x10   : > { %175 = sbr.rel (%p172_p9) target bundleno = 180 (0xb4), region = 32  ;;  %s406_s11 = sshll.u32 (!%p172_p9), %s672_s10, 4 }
  0x11   : > { %s435_s12 = sshll.u32 (!%p172_p9), %s631_s19, 4  ;;  %s201_s13 = scalar_lea.vmem (!%p172_p9), [#allocation4], %s406_s11 }
  0x12   : > { %s303_s22 = scalar_lea.hbm (!%p172_p9), %s741_s4, %s435_s12  ;;  %s304_s23 = sshll.u32 (!%p172_p9), %s201_s13, 4  ;;  %s305_s23 = int_to_ptr.vmem [resolvable:$true] %s304_s23 }
  0x13   : > { %s505_s14 = scalar_lea.hbm (!%p172_p9), %s741_s4, 32 }
  0x15   : > { %v434_v0 = vld [vmem:[%s739_s2] sm:$0xff]  ;;  %s203_s29 = scalar_select %p202_p10, %s631_s19, 1  ;;  %v581_v3 = vmov 1.0   ;;  %vm222_vm3 = vcmask 130048   ;;  %v582_v8 = vmov 1.0|1.0  }
  0x16   : > { %258 = vmatpush.bf16.msra.mxu1 %v434_v0  ;;  %v433_v7 = vld [vmem:[%s738_s1] sm:$0xff]  ;;  %s306_s19 = sshll.u32 %s303_s22, 4  ;;  %s307_s19 = int_to_ptr.hbm [resolvable:$true] %s306_s19 }
  0x17   : > { %s432_s30 = sshll.u32 %s203_s29, 4  ;;  %s286_s29 = scalar_lea.hbm %s740_s3, %s435_s12 }
  0x18   : > { %s206_s7 = scalar_lea.vmem %s737_s0, %s432_s30  ;;  %s683_s30 = scalar_lea.vmem [#allocation2], %s406_s11 }
  0x19   : > { %v208_v1 = vld [vmem:[%s206_s7] sm:$0xff]  ;;  %v209_v2 = vld [vmem:[%s206_s7 + $0x8] sm:$0xff]  ;;  %s287_s5 = sshll.u32 %s683_s30, 4  ;;  %s289_s6 = sshll.u32 %s286_s29, 4  ;;  %s688_s5 = int_to_ptr.vmem [resolvable:$true] %s287_s5  ;;  %s691_s6 = int_to_ptr.hbm [resolvable:$true] %s289_s6 }
  0x1a   : > { %vm210_vm0 = vcmp.ne.s32.totalorder %v208_v1, 0  ;;  %vm211_vm1 = vcmp.ne.s32.totalorder %v209_v2, 0  ;;  %s275_s7 = scalar_lea.sflag [#allocation5], %s672_s10  ;;  %s499_s8 = sshra.s32 %s307_s19, 4  ;;  %s500_s8 = int_to_ptr.hbm [resolvable:$true] %s499_s8 }
  0x1b   : > { %v212_v4 = vsel %vm210_vm0, 0.0, %v581_v3  ;;  %v213_v5 = vsel %vm211_vm1, 0.0, %v581_v3  ;;  %vm414_vm2 = vmneg %vm211_vm1  ;;  %s501_s9 = scalar_lea.hbm %s500_s8, 16  ;;  %p506_p0 = scmp.lt.s32.totalorder %s500_s8, %s741_s4 }
  0x1c   : > { %vm415_vm4 = vmneg %vm210_vm0  ;;  %v214_v6 = vpack.c.bf16 %v213_v5, %v212_v4  ;;  %p502_p11 = scmp.ne.s32.totalorder %s500_s8, %s501_s9  ;;  %p507_p1 = scmp.lt.s32.totalorder %s505_s14, %s501_s9 }
  0x1d   : > { %vm416_vm5 = vmpackc.low %vm414_vm2, %vm415_vm4 }
  0x1e   : > { %417 = vmatpush.bf16.msk.msra.mxu0 %vm416_vm5, %v582_v8  ;;  %423 = vmatmul.msk.bf16.vlgmr.msra.gmra.mxu1 %vm222_vm3, %v214_v6  ;;  %p503_p12 = pnand %p502_p11, %p648_p5  ;;  %p508_p2 = por %p507_p1, %p506_p0 }
  0x20   : > { %p504_p13 = pneg %p503_p12 }
  0x21   : > { %418 = vmatmul.msk.bf16.vlgmr.msra.gmra.mxu0 %vm222_vm3, %v433_v7 }
  0x22   : > { %p509_p3 = pnand %p508_p2, %p504_p13 }
  0x9b   : > { %v260_v9 = vpop.f32.mrf.mxu1 }
  0x9c   : > { %267 = vst.msk [vmem:[%s201_s13] sm:$0xff] %vm222_vm3, %v260_v9 }
  0x9e   : > { %v235_v10 = vpop.f32.mrf.mxu0 }
  0x9f   : > { %265 = vst.msk [vmem:[%s683_s30] sm:$0xff] %vm222_vm3, %v235_v10 }
  0xa3   : > { %v262_v11 = vpop.f32.mrf.mxu1 }
  0xa4   : > { %268 = vst.msk [vmem:[%s201_s13 + $0x8] sm:$0xff] %vm222_vm3, %v262_v11 }
  0xa5   : > { %512 = shalt.err (!%p509_p3)
}
  0xa6   : > { %s583_s13 = smov 128   ;;  %s584_s27 = smov 8   ;;  %v237_v12 = vpop.f32.mrf.mxu0 }
  0xa7   : > { %438 = dma.vmem_to_hbm [thread:$0]  (%p648_p5), %s305_s23, 256, %s307_s19, %s275_s7, %s583_s13, %s583_s13, %s584_s27  }
  0xa8   : > { %266 = vst.msk [vmem:[%s683_s30 + $0x8] sm:$0xff] %vm222_vm3, %v237_v12  ;;  %s270_s28 = scalar_lea.sflag [#allocation3], %s672_s10  ;;  %s527_s29 = sshra.s32 %s691_s6, 4  ;;  %s528_s29 = int_to_ptr.hbm [resolvable:$true] %s527_s29 }
  0xa9   : > { %s529_s8 = scalar_lea.hbm %s528_s29, 16  ;;  %s533_s12 = scalar_lea.hbm %s740_s3, 32 }
  0xaa   : > { %p530_p4 = scmp.ne.s32.totalorder %s528_s29, %s529_s8  ;;  %p534_p9 = scmp.lt.s32.totalorder %s528_s29, %s740_s3 }
  0xab   : > { %p535_p10 = scmp.lt.s32.totalorder %s533_s12, %s529_s8 }
  0xac   : > { %p531_p7 = pnand %p530_p4, %p648_p5 }
  0xad   : > { %p536_p11 = por %p535_p10, %p534_p9 }
  0xae   : > { %p532_p8 = pneg %p531_p7 }
  0xb0   : > { %p537_p12 = pnand %p536_p11, %p532_p8 }
  0xb2   : > { %540 = shalt.err (!%p537_p12)
}
  0xb3   : > { %437 = dma.vmem_to_hbm [thread:$0]  (%p648_p5), %s688_s5, 256, %s691_s6, %s270_s28, %s583_s13, %s583_s13, %s584_s27  }
  0xb4 PF: > { %p448_p13 = scmp.ge.s32.totalorder %s579_s18, 2  ;;  %s321_s10 = sand.u32 1, %s567_s15  }
  0xb5   : > { %s322_s23 = scalar_lea.sflag [#allocation3], %s321_s10 }
  0xb6   : > { %p442_p0 = pnand %p448_p13, %p652_p6 }
  0xb8   : > { %p443_p1 = pneg %p442_p0 }
  0xba   : > { %558 = dma.done.wait (%p443_p1), %s322_s23, 256  }
  0xbb   : > { %560 = vsyncadd (%p443_p1), %s322_s23, 4294967040  ;;  %s332_s30 = scalar_lea.sflag [#allocation5], %s321_s10 }
  0xbc   : > { %562 = dma.done.wait (%p443_p1), %s332_s30, 256  }
  0xbd   : > { %564 = vsyncadd (%p443_p1), %s332_s30, 4294967040  ;;  %p18_p5 = scmp.ge.s32.totalorder %s635_s21, 4   ;;  %s744_s15 = smov %s571_s16 }
  0xbe   : > { %s745_s16 = smov %s575_s17  ;;  %s746_s17 = smov %s646_s24 }
  0xbf   : > { %s747_s18 = smov %s635_s21  ;;  %20 = sbr.rel (!%p18_p5) target bundleno = 5 (0x5), region = 84 }
  0xc4   :  { %338 = vsyncpa [#allocation3], 1 }
  0xc5   :  { %340 = vsyncpa [#allocation3 + $0x1], 1 }
  0xc6   :  { %341 = vsyncpa [#allocation5], 1 }
  0xc7   :  { %343 = vsyncpa [#allocation5 + $0x1], 1 }

</bundles_post_ra>
